<compile_context>
chip_gen: v7x
topology: tpu7x:2x2x1
jax: 0.10.0
libtpu: 0.0.40
codegen_flags: <defaults>
</compile_context>

<pallas_src>
import functools

import jax
import jax.numpy as jnp
import numpy as np
from jax import lax
from jax.experimental import pallas as pl
from jax.experimental.pallas import tpu as pltpu

LANE = 128


def _round_up(n, m):
    return ((n + m - 1) // m) * m


def _pad2d(a, rows, cols):
    return jnp.pad(a, ((0, rows - a.shape[0]), (0, cols - a.shape[1])))


# --------------------------------------------------------------------------- #
# Stage 1: MLP embedding kernel (row-tiled, weights resident in VMEM)
# --------------------------------------------------------------------------- #
def make_mlp_kernel(n_lin, compute_dtype, activation):
    def kernel(*refs):
        x_ref = refs[0]
        w_refs = refs[1:1 + n_lin]
        b_ref = refs[1 + n_lin]          # [n_lin, 1, P_max], f32
        out_ref = refs[-1]

        h = x_ref[...]                   # [TM, in_pad], compute_dtype
        for i in range(n_lin):
            w = w_refs[i][...]           # [in_pad_i, out_pad_i], compute_dtype
            acc = jnp.dot(h, w, preferred_element_type=jnp.float32)
            acc = acc + b_ref[i][:, : w.shape[1]]      # f32 bias, broadcast over rows
            if i < n_lin - 1:
                if activation == "relu":
                    acc = jnp.maximum(acc, 0.0)
                else:                                   # 'lrelu' (PyTorch default slope)
                    acc = jnp.where(acc > 0, acc, 0.01 * acc)
            h = acc.astype(compute_dtype)
        out_ref[...] = h

    return kernel


def mlp_forward(x, params, *, compute_dtype, activation, row_tile=128):
    """params: list of (W[in,out], b[1,out]).  Returns padded [N_pad, E_pad] embeddings."""
    n, _ = x.shape
    n_lin = len(params)

    in_dims = [w.shape[0] for (w, _) in params]
    out_dims = [w.shape[1] for (w, _) in params]
    in_pads = [_round_up(d, LANE) for d in in_dims]
    out_pads = [_round_up(d, LANE) for d in out_dims]
    p_max = max(out_pads)
    n_pad = _round_up(n, row_tile)

    x_pad = _pad2d(x, n_pad, in_pads[0]).astype(compute_dtype)
    w_pads = [
        _pad2d(w, in_pads[i], out_pads[i]).astype(compute_dtype)
        for i, (w, _) in enumerate(params)
    ]
    # Pack all biases into a single [n_lin, 1, P_max] f32 array.
    b_pack = jnp.stack(
        [jnp.pad(b.reshape(1, -1).astype(jnp.float32),
                 ((0, 0), (0, p_max - b.shape[-1]))) for (_, b) in params],
        axis=0,
    )

    grid = (n_pad // row_tile,)
    in_specs = [pl.BlockSpec((row_tile, in_pads[0]), lambda i: (i, 0))]
    for w in w_pads:
        in_specs.append(pl.BlockSpec(w.shape, lambda i: (0, 0)))       # resident
    in_specs.append(pl.BlockSpec(b_pack.shape, lambda i: (0, 0, 0)))   # resident
    out_spec = pl.BlockSpec((row_tile, out_pads[-1]), lambda i: (i, 0))

    return pl.pallas_call(
        make_mlp_kernel(n_lin, compute_dtype, activation),
        out_shape=jax.ShapeDtypeStruct((n_pad, out_pads[-1]), compute_dtype),
        grid=grid,
        in_specs=in_specs,
        out_specs=out_spec,
        compiler_params=pltpu.CompilerParams(dimension_semantics=("parallel",)),
    )(x_pad, *w_pads, b_pack)


# --------------------------------------------------------------------------- #
# Stage 2: score matmul kernel, tiled over the [Ny, Nx] output
# --------------------------------------------------------------------------- #
def score_kernel(hy_ref, gx_ref, out_ref):
    # Contract the shared embed axis of both tiles directly (no transpose).
    out_ref[...] = lax.dot_general(
        hy_ref[...], gx_ref[...],
        dimension_numbers=(((1,), (1,)), ((), ())),
        preferred_element_type=jnp.float32,
    )


def score_matmul(hy_pad, gx_pad, *, tm=128, tn=128):
    ny_pad, e_pad = hy_pad.shape
    nx_pad = gx_pad.shape[0]
    return pl.pallas_call(
        score_kernel,
        out_shape=jax.ShapeDtypeStruct((ny_pad, nx_pad), jnp.float32),
        grid=(ny_pad // tm, nx_pad // tn),
        in_specs=[
            pl.BlockSpec((tm, e_pad), lambda i, j: (i, 0)),
            pl.BlockSpec((tn, e_pad), lambda i, j: (j, 0)),
        ],
        out_specs=pl.BlockSpec((tm, tn), lambda i, j: (i, j)),
        compiler_params=pltpu.CompilerParams(
            dimension_semantics=("parallel", "parallel")),
    )(hy_pad, gx_pad)


# --------------------------------------------------------------------------- #
# Public wrapper: SeparableCritic.forward(x, y)
# --------------------------------------------------------------------------- #
@functools.partial(jax.jit, static_argnames=("activation", "compute_dtype",
                                             "row_tile", "tm", "tn"))
def separable_critic(x, y, g_params, h_params, *, activation="relu",
                     compute_dtype=jnp.bfloat16, row_tile=128, tm=128, tn=128):
    """g_params / h_params: list of (W[in,out], b[1,out]) tuples (pre-transposed)."""
    nx, ny = x.shape[0], y.shape[0]
    gx = mlp_forward(x, g_params, compute_dtype=compute_dtype,
                     activation=activation, row_tile=row_tile)   # [Nx_pad, E_pad]
    hy = mlp_forward(y, h_params, compute_dtype=compute_dtype,
                     activation=activation, row_tile=row_tile)   # [Ny_pad, E_pad]
    scores_pad = score_matmul(hy, gx, tm=tm, tn=tn)              # [Ny_pad, Nx_pad] f32
    return scores_pad[:ny, :nx]


# --------------------------------------------------------------------------- #
# Reference + init
# --------------------------------------------------------------------------- #
def init_mlp_params(key, dim, hidden_dim, embed_dim, n_layers):
    """Deterministic synthetic init. Returns list of (W[in,out], b[1,out])."""
    sizes = ([(dim, hidden_dim)] + [(hidden_dim, hidden_dim)] * n_layers
             + [(hidden_dim, embed_dim)])
    params = []
    for (fan_in, fan_out) in sizes:
        key, kw, kb = jax.random.split(key, 3)
        w = jax.random.normal(kw, (fan_in, fan_out), dtype=jnp.float32) * 0.1
        b = jax.random.normal(kb, (1, fan_out), dtype=jnp.float32) * 0.1
        params.append((w, b))
    return key, params


def reference_forward(x, y, g_params, h_params, activation="relu"):
    """Pure-JAX reference mirroring the PyTorch forward."""
    def mlp_fn(inp, params):
        h = inp
        for i, (w, b) in enumerate(params):
            h = h @ w + b
            if i < len(params) - 1:
                h = jnp.maximum(h, 0.0) if activation == "relu" else jnp.where(h > 0, h, 0.01 * h)
        return h
    return mlp_fn(y, h_params) @ mlp_fn(x, g_params).T


if __name__ == "__main__":
    # Module config: mlp(dim, hidden, embed, layers=1, activation='relu')
    dim, hidden_dim, embed_dim, n_layers = 8, 32, 16, 1
    Nx, Ny = 16, 16

    key = jax.random.PRNGKey(0)
    key, kx, ky = jax.random.split(key, 3)
    x = jax.random.normal(kx, (Nx, dim), dtype=jnp.float32)
    y = jax.random.normal(ky, (Ny, dim), dtype=jnp.float32)

    key, g_params = init_mlp_params(key, dim, hidden_dim, embed_dim, n_layers)
    key, h_params = init_mlp_params(key, dim, hidden_dim, embed_dim, n_layers)

    ref = reference_forward(x, y, g_params, h_params)

    # f32 path (exact-math check).
    s_f32 = jax.block_until_ready(
        separable_critic(x, y, tuple(g_params), tuple(h_params),
                         compute_dtype=jnp.float32))
    np.testing.assert_allclose(np.asarray(s_f32), np.asarray(ref),
                               rtol=1e-4, atol=1e-5)

    # bf16 operands + f32 accumulation (MXU-peak dtype on v5e/v6e/v7x).
    s_bf16 = jax.block_until_ready(
        separable_critic(x, y, tuple(g_params), tuple(h_params),
                         compute_dtype=jnp.bfloat16))
    np.testing.assert_allclose(np.asarray(s_bf16), np.asarray(ref),
                               rtol=5e-2, atol=5e-3)

    print("KERNEL_OK")
</pallas_src>

<mosaic_0001>
module attributes {stable_mosaic.version = 11 : i64} {
  func.func @score_kernel(%arg0: i32, %arg1: i32, %arg2: memref<128x128xf32, #tpu.memory_space<vmem>>, %arg3: memref<128x128xf32, #tpu.memory_space<vmem>>, %arg4: memref<128x128xf32, #tpu.memory_space<vmem>>) attributes {dimension_semantics = [#tpu.dimension_semantics<parallel>, #tpu.dimension_semantics<parallel>], iteration_bounds = array<i64: 1, 1>, scalar_prefetch = 0 : i64, scratch_operands = 0 : i64, tpu.core_type = #tpu.core_type<tc>, window_params = [{transform_indices = @transform_0, window_bounds = array<i64: 128, 128>}, {transform_indices = @transform_1, window_bounds = array<i64: 128, 128>}, {transform_indices = @transform_2, window_bounds = array<i64: 128, 128>}]} {
    %c0 = arith.constant 0 : index
    %c0_0 = arith.constant 0 : index
    %0 = vector.load %arg2[%c0, %c0_0] : memref<128x128xf32, #tpu.memory_space<vmem>>, vector<128x128xf32>
    %c0_1 = arith.constant 0 : index
    %c0_2 = arith.constant 0 : index
    %1 = vector.load %arg3[%c0_1, %c0_2] : memref<128x128xf32, #tpu.memory_space<vmem>>, vector<128x128xf32>
    %cst = arith.constant dense<0.000000e+00> : vector<128x128xf32>
    %2 = tpu.matmul %0, %1, %cst {dimension_numbers = #tpu.dot_dimension_numbers<[1], [1], [0], [0], [0, 0, 1, 0], [], []>} : vector<128x128xf32>, vector<128x128xf32>, vector<128x128xf32> -> vector<128x128xf32>
    %c0_3 = arith.constant 0 : index
    %c0_4 = arith.constant 0 : index
    %3 = vector.load %arg4[%c0_3, %c0_4] : memref<128x128xf32, #tpu.memory_space<vmem>>, vector<128x128xf32>
    tpu.vector_store %arg4[%c0_3, %c0_4], %2 {strides = array<i32>} : memref<128x128xf32, #tpu.memory_space<vmem>>, vector<128x128xf32>,
    return
  }
  func.func @transform_0(%arg0: i32, %arg1: i32) -> (i32, i32) {
    %c0_i32 = arith.constant 0 : i32
    %c0_i32_0 = arith.constant 0 : i32
    return %arg0, %c0_i32 : i32, i32
  }
  func.func @transform_1(%arg0: i32, %arg1: i32) -> (i32, i32) {
    %c0_i32 = arith.constant 0 : i32
    %c0_i32_0 = arith.constant 0 : i32
    return %arg1, %c0_i32 : i32, i32
  }
  func.func @transform_2(%arg0: i32, %arg1: i32) -> (i32, i32) {
    %c0_i32 = arith.constant 0 : i32
    return %arg0, %arg1 : i32, i32
  }
}

module attributes {stable_mosaic.version = 11 : i64} {
  func.func @kernel(%arg0: i32, %arg1: memref<128x128xf32, #tpu.memory_space<vmem>>, %arg2: memref<128x128xf32, #tpu.memory_space<vmem>>, %arg3: memref<128x128xf32, #tpu.memory_space<vmem>>, %arg4: memref<128x128xf32, #tpu.memory_space<vmem>>, %arg5: memref<3x1x128xf32, #tpu.memory_space<vmem>>, %arg6: memref<128x128xf32, #tpu.memory_space<vmem>>) attributes {dimension_semantics = [#tpu.dimension_semantics<parallel>], iteration_bounds = array<i64: 1>, scalar_prefetch = 0 : i64, scratch_operands = 0 : i64, tpu.core_type = #tpu.core_type<tc>, window_params = [{transform_indices = @transform_0, window_bounds = array<i64: 128, 128>}, {pipeline_mode = #tpu.pipeline_mode<synchronous>, transform_indices = @transform_1, window_bounds = array<i64: 128, 128>}, {pipeline_mode = #tpu.pipeline_mode<synchronous>, transform_indices = @transform_2, window_bounds = array<i64: 128, 128>}, {pipeline_mode = #tpu.pipeline_mode<synchronous>, transform_indices = @transform_3, window_bounds = array<i64: 128, 128>}, {pipeline_mode = #tpu.pipeline_mode<synchronous>, transform_indices = @transform_4, window_bounds = array<i64: 3, 1, 128>}, {transform_indices = @transform_5, window_bounds = array<i64: 128, 128>}]} {
    %c0 = arith.constant 0 : index
    %c0_0 = arith.constant 0 : index
    %0 = vector.load %arg1[%c0, %c0_0] : memref<128x128xf32, #tpu.memory_space<vmem>>, vector<128x128xf32>
    %c0_1 = arith.constant 0 : index
    %c0_2 = arith.constant 0 : index
    %1 = vector.load %arg2[%c0_1, %c0_2] : memref<128x128xf32, #tpu.memory_space<vmem>>, vector<128x128xf32>
    %cst = arith.constant dense<0.000000e+00> : vector<128x128xf32>
    %2 = tpu.matmul %0, %1, %cst {dimension_numbers = #tpu.dot_dimension_numbers<[1], [0], [0], [1], [0, 0, 1, 1], [], []>} : vector<128x128xf32>, vector<128x128xf32>, vector<128x128xf32> -> vector<128x128xf32>
    %c0_3 = arith.constant 0 : index
    %c0_4 = arith.constant 0 : index
    %c0_5 = arith.constant 0 : index
    %3 = vector.load %arg5[%c0_3, %c0_4, %c0_5] : memref<3x1x128xf32, #tpu.memory_space<vmem>>, vector<1x1x128xf32>
    %4 = vector.shape_cast %3 : vector<1x1x128xf32> to vector<1x128xf32>
    %5 = vector.broadcast %4 : vector<1x128xf32> to vector<128x128xf32>
    %6 = arith.addf %2, %5 : vector<128x128xf32>
    %cst_6 = arith.constant 0.000000e+00 : f32
    %7 = vector.broadcast %cst_6 : f32 to vector<128x128xf32>
    %8 = arith.maximumf %6, %7 : vector<128x128xf32>
    %c0_7 = arith.constant 0 : index
    %c0_8 = arith.constant 0 : index
    %9 = vector.load %arg3[%c0_7, %c0_8] : memref<128x128xf32, #tpu.memory_space<vmem>>, vector<128x128xf32>
    %cst_9 = arith.constant dense<0.000000e+00> : vector<128x128xf32>
    %10 = tpu.matmul %8, %9, %cst_9 {dimension_numbers = #tpu.dot_dimension_numbers<[1], [0], [0], [1], [0, 0, 1, 1], [], []>} : vector<128x128xf32>, vector<128x128xf32>, vector<128x128xf32> -> vector<128x128xf32>
    %c1 = arith.constant 1 : index
    %c0_10 = arith.constant 0 : index
    %c0_11 = arith.constant 0 : index
    %11 = vector.load %arg5[%c1, %c0_10, %c0_11] : memref<3x1x128xf32, #tpu.memory_space<vmem>>, vector<1x1x128xf32>
    %12 = vector.shape_cast %11 : vector<1x1x128xf32> to vector<1x128xf32>
    %13 = vector.broadcast %12 : vector<1x128xf32> to vector<128x128xf32>
    %14 = arith.addf %10, %13 : vector<128x128xf32>
    %cst_12 = arith.constant 0.000000e+00 : f32
    %15 = vector.broadcast %cst_12 : f32 to vector<128x128xf32>
    %16 = arith.maximumf %14, %15 : vector<128x128xf32>
    %c0_13 = arith.constant 0 : index
    %c0_14 = arith.constant 0 : index
    %17 = vector.load %arg4[%c0_13, %c0_14] : memref<128x128xf32, #tpu.memory_space<vmem>>, vector<128x128xf32>
    %cst_15 = arith.constant dense<0.000000e+00> : vector<128x128xf32>
    %18 = tpu.matmul %16, %17, %cst_15 {dimension_numbers = #tpu.dot_dimension_numbers<[1], [0], [0], [1], [0, 0, 1, 1], [], []>} : vector<128x128xf32>, vector<128x128xf32>, vector<128x128xf32> -> vector<128x128xf32>
    %c2 = arith.constant 2 : index
    %c0_16 = arith.constant 0 : index
    %c0_17 = arith.constant 0 : index
    %19 = vector.load %arg5[%c2, %c0_16, %c0_17] : memref<3x1x128xf32, #tpu.memory_space<vmem>>, vector<1x1x128xf32>
    %20 = vector.shape_cast %19 : vector<1x1x128xf32> to vector<1x128xf32>
    %21 = vector.broadcast %20 : vector<1x128xf32> to vector<128x128xf32>
    %22 = arith.addf %18, %21 : vector<128x128xf32>
    %c0_18 = arith.constant 0 : index
    %c0_19 = arith.constant 0 : index
    %23 = vector.load %arg6[%c0_18, %c0_19] : memref<128x128xf32, #tpu.memory_space<vmem>>, vector<128x128xf32>
    tpu.vector_store %arg6[%c0_18, %c0_19], %22 {strides = array<i32>} : memref<128x128xf32, #tpu.memory_space<vmem>>, vector<128x128xf32>,
    return
  }
  func.func @transform_0(%arg0: i32) -> (i32, i32) {
    %c0_i32 = arith.constant 0 : i32
    %c0_i32_0 = arith.constant 0 : i32
    return %arg0, %c0_i32 : i32, i32
  }
  func.func @transform_1(%arg0: i32) -> (i32, i32) {
    %c0_i32 = arith.constant 0 : i32
    %c0_i32_0 = arith.constant 0 : i32
    %c0_i32_1 = arith.constant 0 : i32
    return %c0_i32, %c0_i32_0 : i32, i32
  }
  func.func @transform_2(%arg0: i32) -> (i32, i32) {
    %c0_i32 = arith.constant 0 : i32
    %c0_i32_0 = arith.constant 0 : i32
    %c0_i32_1 = arith.constant 0 : i32
    return %c0_i32, %c0_i32_0 : i32, i32
  }
  func.func @transform_3(%arg0: i32) -> (i32, i32) {
    %c0_i32 = arith.constant 0 : i32
    %c0_i32_0 = arith.constant 0 : i32
    %c0_i32_1 = arith.constant 0 : i32
    return %c0_i32, %c0_i32_0 : i32, i32
  }
  func.func @transform_4(%arg0: i32) -> (i32, i32, i32) {
    %c0_i32 = arith.constant 0 : i32
    %c0_i32_0 = arith.constant 0 : i32
    %c0_i32_1 = arith.constant 0 : i32
    %c0_i32_2 = arith.constant 0 : i32
    return %c0_i32, %c0_i32_0, %c0_i32_1 : i32, i32, i32
  }
  func.func @transform_5(%arg0: i32) -> (i32, i32) {
    %c0_i32 = arith.constant 0 : i32
    %c0_i32_0 = arith.constant 0 : i32
    return %arg0, %c0_i32 : i32, i32
  }
}

</mosaic_0001>

<bundles_post_ra>
// kernel: separable_critic.5
= control target key start
LH: loop header
LB: loop body
LE: loop exit
PB: predicated region body
PF: predicated region fallthrough
CT: control target
= control target key end

     0   :  { %s503_s1 = inlined_call_operand.vmem [shape: f32[128,128], index: 1, kind: input, shape index: {}]   ;;  %s504_s0 = inlined_call_operand.vmem [shape: f32[128,128], index: 0, kind: input, shape index: {}]   ;;  %s505_s2 = inlined_call_operand.vmem [shape: f32[128,128], index: 2, kind: output, shape index: {}]  }
   0x1   :  { %v27_v0 = vld [vmem:[%s503_s1] sm:$0xff]  ;;  %v28_v1 = vld [vmem:[%s503_s1 + $0x8] sm:$0xff]  ;;  %v29_v2 = vld [vmem:[%s503_s1 + $0x10] sm:$0xff] }
   0x2   :  { %v296_v3 = vpack.c.bf16 %v28_v1, %v27_v0  ;;  %v30_v4 = vld [vmem:[%s503_s1 + $0x18] sm:$0xff]  ;;  %v11_v6 = vld [vmem:[%s504_s0] sm:$0xff]  ;;  %v32_v9 = vld [vmem:[%s503_s1 + $0x28] sm:$0xff] }
   0x3   :  { %v300_v5 = vpack.c.bf16 %v30_v4, %v29_v2  ;;  %v19_v7 = vld [vmem:[%s504_s0 + $0x40] sm:$0xff]  ;;  %272 = vmatprep.mubr.f32.mxu0 %v11_v6  ;;  %v33_v11 = vld [vmem:[%s503_s1 + $0x30] sm:$0xff]  ;;  %v34_v12 = vld [vmem:[%s503_s1 + $0x38] sm:$0xff] }
   0x4   :  { %297 = vmatprep.subr.bf16.mxu0 %v296_v3  ;;  %328 = vmatprep.subr.bf16.mxu1 %v296_v3  ;;  %v31_v8 = vld [vmem:[%s503_s1 + $0x20] sm:$0xff]  ;;  %v308_v13 = vpack.c.bf16 %v34_v12, %v33_v11  ;;  %v36_v15 = vld [vmem:[%s503_s1 + $0x48] sm:$0xff]  ;;  %v37_v17 = vld [vmem:[%s503_s1 + $0x50] sm:$0xff] }
   0x5   :  { %299 = vmatpush3.bf16.xpose.msra.mxu0 %v296_v3  ;;  %336 = vmatpush3.bf16.xpose.msra.mxu1 %v296_v3  ;;  %v304_v10 = vpack.c.bf16 %v32_v9, %v31_v8  ;;  %v35_v14 = vld [vmem:[%s503_s1 + $0x40] sm:$0xff]  ;;  %v38_v18 = vld [vmem:[%s503_s1 + $0x58] sm:$0xff]  ;;  %v40_v21 = vld [vmem:[%s503_s1 + $0x68] sm:$0xff] }
   0x6   :  { %301 = vmatprep.subr.bf16.mxu0 %v300_v5  ;;  %329 = vmatprep.subr.bf16.mxu1 %v300_v5  ;;  %v312_v16 = vpack.c.bf16 %v36_v15, %v35_v14  ;;  %v316_v19 = vpack.c.bf16 %v38_v18, %v37_v17  ;;  %v39_v20 = vld [vmem:[%s503_s1 + $0x60] sm:$0xff]  ;;  %v41_v23 = vld [vmem:[%s503_s1 + $0x70] sm:$0xff]  ;;  %v42_v24 = vld [vmem:[%s503_s1 + $0x78] sm:$0xff] }
   0x7   :  { %284 = vmatprep.mubr.f32.mxu1 %v19_v7  ;;  %v320_v22 = vpack.c.bf16 %v40_v21, %v39_v20  ;;  %v324_v25 = vpack.c.bf16 %v42_v24, %v41_v23  ;;  %v12_v26 = vld [vmem:[%s504_s0 + $0x8] sm:$0xff]  ;;  %v13_v28 = vld [vmem:[%s504_s0 + $0x10] sm:$0xff]  ;;  %v14_v30 = vld [vmem:[%s504_s0 + $0x18] sm:$0xff] }
   0x8   :  { %v20_v27 = vld [vmem:[%s504_s0 + $0x48] sm:$0xff]  ;;  %v21_v29 = vld [vmem:[%s504_s0 + $0x50] sm:$0xff]  ;;  %v22_v31 = vld [vmem:[%s504_s0 + $0x58] sm:$0xff] }
   0x9   :  { %v15_v32 = vld [vmem:[%s504_s0 + $0x20] sm:$0xff]  ;;  %v16_v34 = vld [vmem:[%s504_s0 + $0x28] sm:$0xff]  ;;  %v17_v36 = vld [vmem:[%s504_s0 + $0x30] sm:$0xff] }
   0xa   :  { %v23_v33 = vld [vmem:[%s504_s0 + $0x60] sm:$0xff]  ;;  %v24_v35 = vld [vmem:[%s504_s0 + $0x68] sm:$0xff]  ;;  %v25_v37 = vld [vmem:[%s504_s0 + $0x70] sm:$0xff] }
   0xb   :  { %v18_v38 = vld [vmem:[%s504_s0 + $0x38] sm:$0xff] }
   0xc   :  { %v26_v39 = vld [vmem:[%s504_s0 + $0x78] sm:$0xff] }
   0xd   :  { %303 = vmatpush3.bf16.xpose.msra.mxu0 %v300_v5  ;;  %337 = vmatpush3.bf16.xpose.msra.mxu1 %v300_v5 }
   0xe   :  { %305 = vmatprep.subr.bf16.mxu0 %v304_v10  ;;  %330 = vmatprep.subr.bf16.mxu1 %v304_v10 }
  0x15   :  { %307 = vmatpush3.bf16.xpose.msra.mxu0 %v304_v10  ;;  %338 = vmatpush3.bf16.xpose.msra.mxu1 %v304_v10 }
  0x16   :  { %309 = vmatprep.subr.bf16.mxu0 %v308_v13  ;;  %331 = vmatprep.subr.bf16.mxu1 %v308_v13 }
  0x1d   :  { %311 = vmatpush3.bf16.xpose.msra.mxu0 %v308_v13  ;;  %339 = vmatpush3.bf16.xpose.msra.mxu1 %v308_v13 }
  0x1e   :  { %313 = vmatprep.subr.bf16.mxu0 %v312_v16  ;;  %332 = vmatprep.subr.bf16.mxu1 %v312_v16 }
  0x25   :  { %315 = vmatpush3.bf16.xpose.msra.mxu0 %v312_v16  ;;  %340 = vmatpush3.bf16.xpose.msra.mxu1 %v312_v16 }
  0x26   :  { %317 = vmatprep.subr.bf16.mxu0 %v316_v19  ;;  %333 = vmatprep.subr.bf16.mxu1 %v316_v19 }
  0x2d   :  { %319 = vmatpush3.bf16.xpose.msra.mxu0 %v316_v19  ;;  %341 = vmatpush3.bf16.xpose.msra.mxu1 %v316_v19 }
  0x2e   :  { %321 = vmatprep.subr.bf16.mxu0 %v320_v22  ;;  %334 = vmatprep.subr.bf16.mxu1 %v320_v22 }
  0x35   :  { %323 = vmatpush3.bf16.xpose.msra.mxu0 %v320_v22  ;;  %342 = vmatpush3.bf16.xpose.msra.mxu1 %v320_v22 }
  0x36   :  { %325 = vmatprep.subr.bf16.mxu0 %v324_v25  ;;  %335 = vmatprep.subr.bf16.mxu1 %v324_v25 }
  0x3d   :  { %327 = vmatpush3.bf16.xpose.msra.mxu0 %v324_v25  ;;  %343 = vmatpush3.bf16.xpose.msra.mxu1 %v324_v25 }
  0x44   :  { %273 = vmatmul.mubr.f32.vlgmr.msra.gmra.mrb[0].mxu0 %v12_v26  ;;  %285 = vmatmul.mubr.f32.vlgmr.msra.gmra.mrb[0].mxu1 %v20_v27 }
  0x45   :  { %275 = vmatprep.mubr.f32.mxu0 %v13_v28  ;;  %287 = vmatprep.mubr.f32.mxu1 %v21_v29 }
  0x48   :  { %276 = vmatmul.mubr.f32.gmra.mrb[2].mxu0 %v14_v30  ;;  %288 = vmatmul.mubr.f32.gmra.mrb[2].mxu1 %v22_v31 }
  0x49   :  { %278 = vmatprep.mubr.f32.mxu0 %v15_v32  ;;  %290 = vmatprep.mubr.f32.mxu1 %v23_v33 }
  0x4c   :  { %279 = vmatmul.mubr.f32.gmra.mrb[4].mxu0 %v16_v34  ;;  %291 = vmatmul.mubr.f32.gmra.mrb[4].mxu1 %v24_v35 }
  0x4d   :  { %281 = vmatprep.mubr.f32.mxu0 %v17_v36  ;;  %293 = vmatprep.mubr.f32.mxu1 %v25_v37 }
  0x50   :  { %282 = vmatmul.mubr.f32.gmra.mrb[6].mxu0 %v18_v38  ;;  %294 = vmatmul.mubr.f32.gmra.mrb[6].mxu1 %v26_v39 }
 0x117   :  { %v274_v40 = vpop.f32.mrb[0].mxu0  ;;  %v286_v41 = vpop.f32.mrb[0].mxu1 }
 0x118   :  { %189 = vst [vmem:[%s505_s2 + $0x8] sm:$0xff] %v274_v40  ;;  %197 = vst [vmem:[%s505_s2 + $0x48] sm:$0xff] %v286_v41  ;;  %v109_v42 = vpop.f32.mrb[1].mxu0  ;;  %v149_v43 = vpop.f32.mrb[1].mxu1 }
 0x119   :  { %188 = vst [vmem:[%s505_s2] sm:$0xff] %v109_v42  ;;  %196 = vst [vmem:[%s505_s2 + $0x40] sm:$0xff] %v149_v43 }
 0x11b   :  { %v277_v44 = vpop.f32.mrb[2].mxu0  ;;  %v289_v45 = vpop.f32.mrb[2].mxu1 }
 0x11c   :  { %191 = vst [vmem:[%s505_s2 + $0x18] sm:$0xff] %v277_v44  ;;  %199 = vst [vmem:[%s505_s2 + $0x58] sm:$0xff] %v289_v45  ;;  %v119_v46 = vpop.f32.mrb[3].mxu0  ;;  %v159_v47 = vpop.f32.mrb[3].mxu1 }
 0x11d   :  { %190 = vst [vmem:[%s505_s2 + $0x10] sm:$0xff] %v119_v46  ;;  %198 = vst [vmem:[%s505_s2 + $0x50] sm:$0xff] %v159_v47 }
 0x11f   :  { %v280_v48 = vpop.f32.mrb[4].mxu0  ;;  %v292_v49 = vpop.f32.mrb[4].mxu1 }
 0x120   :  { %193 = vst [vmem:[%s505_s2 + $0x28] sm:$0xff] %v280_v48  ;;  %201 = vst [vmem:[%s505_s2 + $0x68] sm:$0xff] %v292_v49  ;;  %v129_v50 = vpop.f32.mrb[5].mxu0  ;;  %v169_v51 = vpop.f32.mrb[5].mxu1 }
 0x121   :  { %192 = vst [vmem:[%s505_s2 + $0x20] sm:$0xff] %v129_v50  ;;  %200 = vst [vmem:[%s505_s2 + $0x60] sm:$0xff] %v169_v51 }
 0x123   :  { %v283_v52 = vpop.f32.mrb[6].mxu0  ;;  %v295_v53 = vpop.f32.mrb[6].mxu1 }
 0x124   :  { %195 = vst [vmem:[%s505_s2 + $0x38] sm:$0xff] %v283_v52  ;;  %203 = vst [vmem:[%s505_s2 + $0x78] sm:$0xff] %v295_v53  ;;  %v139_v54 = vpop.f32.mrb[7].mxu0  ;;  %v179_v55 = vpop.f32.mrb[7].mxu1 }
 0x125   :  { %194 = vst [vmem:[%s505_s2 + $0x30] sm:$0xff] %v139_v54  ;;  %202 = vst [vmem:[%s505_s2 + $0x70] sm:$0xff] %v179_v55 }

// kernel: separable_critic.3
= control target key start
LH: loop header
LB: loop body
LE: loop exit
PB: predicated region body
PF: predicated region fallthrough
CT: control target
= control target key end

     0   :  { %s1296_s1 = inlined_call_operand.vmem [shape: f32[128,128], index: 1, kind: input, shape index: {}]   ;;  %s1297_s0 = inlined_call_operand.vmem [shape: f32[128,128], index: 0, kind: input, shape index: {}]   ;;  %s1298_s2 = inlined_call_operand.vmem [shape: f32[128,128], index: 2, kind: input, shape index: {}]   ;;  %s1299_s3 = inlined_call_operand.vmem [shape: f32[128,128], index: 3, kind: input, shape index: {}]   ;;  %s1300_s4 = inlined_call_operand.vmem [shape: f32[3,1,128], index: 4, kind: input, shape index: {}]   ;;  %s1301_s5 = inlined_call_operand.vmem [shape: f32[128,128], index: 5, kind: output, shape index: {}]  }
   0x1   :  { %v36_v0 = vld [vmem:[%s1296_s1] sm:$0xff]  ;;  %v37_v1 = vld [vmem:[%s1296_s1 + $0x8] sm:$0xff]  ;;  %v38_v2 = vld [vmem:[%s1296_s1 + $0x10] sm:$0xff] }
   0x2   :  { %v863_v3 = vpack.c.bf16 %v37_v1, %v36_v0  ;;  %v39_v4 = vld [vmem:[%s1296_s1 + $0x18] sm:$0xff]  ;;  %v40_v6 = vld [vmem:[%s1296_s1 + $0x20] sm:$0xff]  ;;  %v41_v7 = vld [vmem:[%s1296_s1 + $0x28] sm:$0xff] }
   0x3   :  { %v867_v5 = vpack.c.bf16 %v39_v4, %v38_v2  ;;  %v871_v8 = vpack.c.bf16 %v41_v7, %v40_v6  ;;  %v20_v9 = vld [vmem:[%s1297_s0] sm:$0xff]  ;;  %v42_v10 = vld [vmem:[%s1296_s1 + $0x30] sm:$0xff]  ;;  %v43_v11 = vld [vmem:[%s1296_s1 + $0x38] sm:$0xff] }
   0x4   :  { %864 = vmatprep.subr.bf16.mxu0 %v863_v3  ;;  %727 = vmatprep.mubr.f32.mxu0 %v20_v9  ;;  %v875_v12 = vpack.c.bf16 %v43_v11, %v42_v10  ;;  %v44_v13 = vld [vmem:[%s1296_s1 + $0x40] sm:$0xff]  ;;  %v45_v14 = vld [vmem:[%s1296_s1 + $0x48] sm:$0xff]  ;;  %v222_v17 = vld [vmem:[%s1298_s2 + $0x10] sm:$0xff] }
   0x5   :  { %866 = vmatpush3.bf16.msra.mxu0 %v863_v3  ;;  %v220_v15 = vld [vmem:[%s1298_s2] sm:$0xff]  ;;  %v221_v16 = vld [vmem:[%s1298_s2 + $0x8] sm:$0xff]  ;;  %v223_v18 = vld [vmem:[%s1298_s2 + $0x18] sm:$0xff]  ;;  %v879_v21 = vpack.c.bf16 %v45_v14, %v44_v13 }
   0x6   :  { %868 = vmatprep.subr.bf16.mxu0 %v867_v5  ;;  %v895_v19 = vpack.c.bf16 %v221_v16, %v220_v15  ;;  %v899_v20 = vpack.c.bf16 %v223_v18, %v222_v17  ;;  %v224_v22 = vld [vmem:[%s1298_s2 + $0x20] sm:$0xff]  ;;  %v225_v23 = vld [vmem:[%s1298_s2 + $0x28] sm:$0xff]  ;;  %v46_v24 = vld [vmem:[%s1296_s1 + $0x50] sm:$0xff] }
   0x7   :  { %v47_v25 = vld [vmem:[%s1296_s1 + $0x58] sm:$0xff]  ;;  %v903_v26 = vpack.c.bf16 %v225_v23, %v224_v22  ;;  %v226_v28 = vld [vmem:[%s1298_s2 + $0x30] sm:$0xff]  ;;  %v48_v30 = vld [vmem:[%s1296_s1 + $0x60] sm:$0xff] }
   0x8   :  { %896 = vmatprep.subr.bf16.mxu1 %v895_v19  ;;  %v883_v27 = vpack.c.bf16 %v47_v25, %v46_v24  ;;  %v227_v29 = vld [vmem:[%s1298_s2 + $0x38] sm:$0xff]  ;;  %v49_v31 = vld [vmem:[%s1296_s1 + $0x68] sm:$0xff]  ;;  %v228_v34 = vld [vmem:[%s1298_s2 + $0x40] sm:$0xff] }
   0x9   :  { %870 = vmatpush3.bf16.msra.mxu0 %v867_v5  ;;  %898 = vmatpush3.bf16.msra.mxu1 %v895_v19  ;;  %v907_v32 = vpack.c.bf16 %v227_v29, %v226_v28  ;;  %v887_v33 = vpack.c.bf16 %v49_v31, %v48_v30  ;;  %v229_v35 = vld [vmem:[%s1298_s2 + $0x48] sm:$0xff]  ;;  %v50_v36 = vld [vmem:[%s1296_s1 + $0x70] sm:$0xff]  ;;  %v51_v37 = vld [vmem:[%s1296_s1 + $0x78] sm:$0xff] }
   0xa   :  { %872 = vmatprep.subr.bf16.mxu0 %v871_v8  ;;  %900 = vmatprep.subr.bf16.mxu1 %v899_v20  ;;  %v911_v38 = vpack.c.bf16 %v229_v35, %v228_v34  ;;  %v891_v39 = vpack.c.bf16 %v51_v37, %v50_v36  ;;  %v230_v40 = vld [vmem:[%s1298_s2 + $0x50] sm:$0xff]  ;;  %v231_v41 = vld [vmem:[%s1298_s2 + $0x58] sm:$0xff]  ;;  %v232_v43 = vld [vmem:[%s1298_s2 + $0x60] sm:$0xff] }
   0xb   :  { %v915_v42 = vpack.c.bf16 %v231_v41, %v230_v40  ;;  %v233_v44 = vld [vmem:[%s1298_s2 + $0x68] sm:$0xff]  ;;  %v22_v47 = vld [vmem:[%s1297_s0 + $0x10] sm:$0xff]  ;;  %v23_v48 = vld [vmem:[%s1297_s0 + $0x18] sm:$0xff] }
   0xc   :  { %v21_v45 = vld [vmem:[%s1297_s0 + $0x8] sm:$0xff]  ;;  %v919_v46 = vpack.c.bf16 %v233_v44, %v232_v43  ;;  %v24_v49 = vld [vmem:[%s1297_s0 + $0x20] sm:$0xff]  ;;  %v26_v51 = vld [vmem:[%s1297_s0 + $0x30] sm:$0xff] }
   0xd   :  { %874 = vmatpush3.bf16.msra.mxu0 %v871_v8  ;;  %902 = vmatpush3.bf16.msra.mxu1 %v899_v20  ;;  %v25_v50 = vld [vmem:[%s1297_s0 + $0x28] sm:$0xff]  ;;  %v27_v52 = vld [vmem:[%s1297_s0 + $0x38] sm:$0xff]  ;;  %v28_v53 = vld [vmem:[%s1297_s0 + $0x40] sm:$0xff] }
   0xe   :  { %876 = vmatprep.subr.bf16.mxu0 %v875_v12  ;;  %904 = vmatprep.subr.bf16.mxu1 %v903_v26  ;;  %v29_v54 = vld [vmem:[%s1297_s0 + $0x48] sm:$0xff]  ;;  %v30_v55 = vld [vmem:[%s1297_s0 + $0x50] sm:$0xff]  ;;  %v31_v56 = vld [vmem:[%s1297_s0 + $0x58] sm:$0xff] }
   0xf   :  { %v32_v57 = vld [vmem:[%s1297_s0 + $0x60] sm:$0xff]  ;;  %v33_v58 = vld [vmem:[%s1297_s0 + $0x68] sm:$0xff]  ;;  %v34_v59 = vld [vmem:[%s1297_s0 + $0x70] sm:$0xff] }
  0x10   :  { %v35_v60 = vld [vmem:[%s1297_s0 + $0x78] sm:$0xff]  ;;  %v234_v61 = vld [vmem:[%s1298_s2 + $0x70] sm:$0xff]  ;;  %v405_v0 = vld [vmem:[%s1299_s3] sm:$0xff] }
  0x11   :  { %878 = vmatpush3.bf16.msra.mxu0 %v875_v12  ;;  %906 = vmatpush3.bf16.msra.mxu1 %v903_v26  ;;  %v235_v62 = vld [vmem:[%s1298_s2 + $0x78] sm:$0xff]  ;;  %v406_v1 = vld [vmem:[%s1299_s3 + $0x8] sm:$0xff]  ;;  %v407_v2 = vld [vmem:[%s1299_s3 + $0x10] sm:$0xff] }
  0x12   :  { %880 = vmatprep.subr.bf16.mxu0 %v879_v21  ;;  %908 = vmatprep.subr.bf16.mxu1 %v907_v32  ;;  %v923_v63 = vpack.c.bf16 %v235_v62, %v234_v61  ;;  %v927_v3 = vpack.c.bf16 %v406_v1, %v405_v0  ;;  %v408_v4 = vld [vmem:[%s1299_s3 + $0x18] sm:$0xff]  ;;  %v409_v6 = vld [vmem:[%s1299_s3 + $0x20] sm:$0xff]  ;;  %v410_v7 = vld [vmem:[%s1299_s3 + $0x28] sm:$0xff] }
  0x13   :  { %v931_v5 = vpack.c.bf16 %v408_v4, %v407_v2  ;;  %v935_v8 = vpack.c.bf16 %v410_v7, %v409_v6  ;;  %v411_v9 = vld [vmem:[%s1299_s3 + $0x30] sm:$0xff]  ;;  %v412_v10 = vld [vmem:[%s1299_s3 + $0x38] sm:$0xff]  ;;  %v413_v12 = vld [vmem:[%s1299_s3 + $0x40] sm:$0xff] }
  0x14   :  { %v1173_v11 = vpack.c.bf16 %v412_v10, %v411_v9  ;;  %v414_v13 = vld [vmem:[%s1299_s3 + $0x48] sm:$0xff]  ;;  %v415_v15 = vld [vmem:[%s1299_s3 + $0x50] sm:$0xff]  ;;  %v416_v16 = vld [vmem:[%s1299_s3 + $0x58] sm:$0xff] }
  0x15   :  { %882 = vmatpush3.bf16.msra.mxu0 %v879_v21  ;;  %910 = vmatpush3.bf16.msra.mxu1 %v907_v32  ;;  %v1182_v14 = vpack.c.bf16 %v414_v13, %v413_v12  ;;  %v1192_v17 = vpack.c.bf16 %v416_v16, %v415_v15  ;;  %v417_v18 = vld [vmem:[%s1299_s3 + $0x60] sm:$0xff]  ;;  %v418_v19 = vld [vmem:[%s1299_s3 + $0x68] sm:$0xff]  ;;  %v419_v6 = vld [vmem:[%s1299_s3 + $0x70] sm:$0xff] }
  0x16   :  { %884 = vmatprep.subr.bf16.mxu0 %v883_v27  ;;  %912 = vmatprep.subr.bf16.mxu1 %v911_v38  ;;  %v1202_v20 = vpack.c.bf16 %v418_v19, %v417_v18  ;;  %v1210_v21 = vld [vmem:[%s1300_s4] ss:$0 sm:$0xff]  ;;  %v420_v7 = vld [vmem:[%s1299_s3 + $0x78] sm:$0xff]  ;;  %v596_v9 = vld [vmem:[%s1300_s4 + $0x1] ss:$0 sm:$0xff] }
  0x19   :  { %886 = vmatpush3.bf16.msra.mxu0 %v883_v27  ;;  %914 = vmatpush3.bf16.msra.mxu1 %v911_v38 }
  0x1a   :  { %888 = vmatprep.subr.bf16.mxu0 %v887_v33  ;;  %916 = vmatprep.subr.bf16.mxu1 %v915_v42 }
  0x1d   :  { %890 = vmatpush3.bf16.msra.mxu0 %v887_v33  ;;  %918 = vmatpush3.bf16.msra.mxu1 %v915_v42 }
  0x1e   :  { %892 = vmatprep.subr.bf16.mxu0 %v891_v39  ;;  %920 = vmatprep.subr.bf16.mxu1 %v919_v46 }
  0x21   :  { %894 = vmatpush3.bf16.msra.mxu0 %v891_v39  ;;  %922 = vmatpush3.bf16.msra.mxu1 %v919_v46 }
  0x22   :  { %924 = vmatprep.subr.bf16.mxu1 %v923_v63  ;;  %928 = vmatprep.subr.bf16.mxu0 %v927_v3 }
  0x24   :  { %728 = vmatmul.mubr.f32.vlgmr.msra.gmra.mrb[0].mxu0 %v21_v45 }
  0x25   :  { %730 = vmatprep.mubr.f32.mxu0 %v22_v47  ;;  %926 = vmatpush3.bf16.msra.mxu1 %v923_v63 }
  0x26   :  { %959 = vmatprep.subr.bf16.mxu1 %v927_v3  ;;  %930 = vmatpush3.bf16.msra.mxu0 %v927_v3 }
  0x27   :  { %932 = vmatprep.subr.bf16.mxu0 %v931_v5 }
  0x28   :  { %731 = vmatmul.mubr.f32.gmra.mrb[2].mxu0 %v23_v48 }
  0x29   :  { %733 = vmatprep.mubr.f32.mxu0 %v24_v49 }
  0x2a   :  { %934 = vmatpush3.bf16.msra.mxu0 %v931_v5 }
  0x2b   :  { %936 = vmatprep.subr.bf16.mxu0 %v935_v8 }
  0x2c   :  { %734 = vmatmul.mubr.f32.gmra.mrb[4].mxu0 %v25_v50 }
  0x2d   :  { %736 = vmatprep.mubr.f32.mxu0 %v26_v51 }
  0x2e   :  { %938 = vmatpush3.bf16.msra.mxu0 %v935_v8 }
  0x2f   :  { %940 = vmatprep.subr.bf16.mxu0 %v1173_v11 }
  0x30   :  { %737 = vmatmul.mubr.f32.gmra.mrb[6].mxu0 %v27_v52 }
  0x31   :  { %739 = vmatprep.mubr.f32.mxu0 %v28_v53 }
  0x32   :  { %942 = vmatpush3.bf16.msra.mxu0 %v1173_v11 }
  0x33   :  { %944 = vmatprep.subr.bf16.mxu0 %v1182_v14 }
  0x34   :  { %740 = vmatmul.mubr.f32.gmra.mrb[8].mxu0 %v29_v54 }
  0x35   :  { %742 = vmatprep.mubr.f32.mxu0 %v30_v55 }
  0x36   :  { %946 = vmatpush3.bf16.msra.mxu0 %v1182_v14 }
  0x37   :  { %948 = vmatprep.subr.bf16.mxu0 %v1192_v17 }
  0x38   :  { %743 = vmatmul.mubr.f32.gmra.mrb[10].mxu0 %v31_v56 }
  0x39   :  { %745 = vmatprep.mubr.f32.mxu0 %v32_v57 }
  0x3a   :  { %950 = vmatpush3.bf16.msra.mxu0 %v1192_v17 }
  0x3b   :  { %952 = vmatprep.subr.bf16.mxu0 %v1202_v20 }
  0x3c   :  { %746 = vmatmul.mubr.f32.gmra.mrb[12].mxu0 %v33_v58 }
  0x3d   :  { %748 = vmatprep.mubr.f32.mxu0 %v34_v59 }
  0x3e   :  { %954 = vmatpush3.bf16.msra.mxu0 %v1202_v20 }
  0x40   :  { %749 = vmatmul.mubr.f32.gmra.mrb[14].mxu0 %v35_v60 }
  0xf7   :  { %v729_v22 = vpop.f32.mrb[0].mxu0 }
  0xf8   :  { %v131_v23 = vadd.f32 %v729_v22, %v1210_v21  ;;  %v125_v24 = vpop.f32.mrb[1].mxu0 }
  0xf9   :  { %v126_v25 = vadd.f32 %v1210_v21, %v125_v24 }
  0xfa   :  { %v205_v28 = vmax.f32 %v131_v23, 0.0 }
  0xfb   :  { %v732_v26 = vpop.f32.mrb[2].mxu0  ;;  %v204_v27 = vmax.f32 %v126_v25, 0.0 }
  0xfc   :  { %v141_v29 = vadd.f32 %v732_v26, %v1210_v21  ;;  %v135_v30 = vpop.f32.mrb[3].mxu0 }
  0xfd   :  { %v136_v31 = vadd.f32 %v1210_v21, %v135_v30  ;;  %783 = vmatprep.mubr.f32.mxu1 %v204_v27 }
  0xfe   :  { %784 = vmatmul.mubr.f32.vlgmr.msra.gmra.mrb[0].mxu1 %v205_v28  ;;  %v207_v34 = vmax.f32 %v141_v29, 0.0 }
  0xff   :  { %v206_v32 = vmax.f32 %v136_v31, 0.0  ;;  %v735_v33 = vpop.f32.mrb[4].mxu0  ;;  %967 = vmatpush3.bf16.msra.mxu1 %v927_v3 }
 0x100   :  { %v151_v35 = vadd.f32 %v735_v33, %v1210_v21  ;;  %v145_v36 = vpop.f32.mrb[5].mxu0  ;;  %960 = vmatprep.subr.bf16.mxu1 %v931_v5 }
 0x101   :  { %v146_v37 = vadd.f32 %v1210_v21, %v145_v36  ;;  %786 = vmatprep.mubr.f32.mxu1 %v206_v32 }
 0x102   :  { %787 = vmatmul.mubr.f32.gmra.mrb[2].mxu1 %v207_v34  ;;  %v209_v40 = vmax.f32 %v151_v35, 0.0 }
 0x103   :  { %v208_v38 = vmax.f32 %v146_v37, 0.0  ;;  %v738_v39 = vpop.f32.mrb[6].mxu0  ;;  %968 = vmatpush3.bf16.msra.mxu1 %v931_v5 }
 0x104   :  { %v161_v41 = vadd.f32 %v738_v39, %v1210_v21  ;;  %v155_v42 = vpop.f32.mrb[7].mxu0  ;;  %961 = vmatprep.subr.bf16.mxu1 %v935_v8 }
 0x105   :  { %v156_v43 = vadd.f32 %v1210_v21, %v155_v42  ;;  %789 = vmatprep.mubr.f32.mxu1 %v208_v38 }
 0x106   :  { %790 = vmatmul.mubr.f32.gmra.mrb[4].mxu1 %v209_v40  ;;  %v211_v46 = vmax.f32 %v161_v41, 0.0 }
 0x107   :  { %v210_v44 = vmax.f32 %v156_v43, 0.0  ;;  %v741_v45 = vpop.f32.mrb[8].mxu0  ;;  %969 = vmatpush3.bf16.msra.mxu1 %v935_v8  ;;  %v955_v8 = vpack.c.bf16 %v420_v7, %v419_v6 }
 0x108   :  { %v171_v47 = vadd.f32 %v741_v45, %v1210_v21  ;;  %v165_v48 = vpop.f32.mrb[9].mxu0  ;;  %962 = vmatprep.subr.bf16.mxu1 %v1173_v11 }
 0x109   :  { %v166_v49 = vadd.f32 %v1210_v21, %v165_v48  ;;  %792 = vmatprep.mubr.f32.mxu1 %v210_v44  ;;  %956 = vmatprep.subr.bf16.mxu0 %v955_v8 }
 0x10a   :  { %793 = vmatmul.mubr.f32.gmra.mrb[6].mxu1 %v211_v46  ;;  %v213_v52 = vmax.f32 %v171_v47, 0.0  ;;  %958 = vmatpush3.bf16.msra.mxu0 %v955_v8 }
 0x10b   :  { %v212_v50 = vmax.f32 %v166_v49, 0.0  ;;  %v744_v51 = vpop.f32.mrb[10].mxu0  ;;  %970 = vmatpush3.bf16.msra.mxu1 %v1173_v11 }
 0x10c   :  { %v181_v53 = vadd.f32 %v744_v51, %v1210_v21  ;;  %v175_v54 = vpop.f32.mrb[11].mxu0  ;;  %963 = vmatprep.subr.bf16.mxu1 %v1182_v14 }
 0x10d   :  { %v176_v55 = vadd.f32 %v1210_v21, %v175_v54  ;;  %795 = vmatprep.mubr.f32.mxu1 %v212_v50 }
 0x10e   :  { %796 = vmatmul.mubr.f32.gmra.mrb[8].mxu1 %v213_v52  ;;  %v215_v58 = vmax.f32 %v181_v53, 0.0 }
 0x10f   :  { %v214_v56 = vmax.f32 %v176_v55, 0.0  ;;  %v747_v57 = vpop.f32.mrb[12].mxu0  ;;  %971 = vmatpush3.bf16.msra.mxu1 %v1182_v14 }
 0x110   :  { %v191_v59 = vadd.f32 %v747_v57, %v1210_v21  ;;  %v185_v60 = vpop.f32.mrb[13].mxu0  ;;  %964 = vmatprep.subr.bf16.mxu1 %v1192_v17 }
 0x111   :  { %v186_v61 = vadd.f32 %v1210_v21, %v185_v60  ;;  %798 = vmatprep.mubr.f32.mxu1 %v214_v56 }
 0x112   :  { %799 = vmatmul.mubr.f32.gmra.mrb[10].mxu1 %v215_v58  ;;  %v217_v0 = vmax.f32 %v191_v59, 0.0  ;;  %v598_v58 = vld [vmem:[%s1300_s4 + $0x2] ss:$0 sm:$0xff] }
 0x113   :  { %v216_v62 = vmax.f32 %v186_v61, 0.0  ;;  %v750_v63 = vpop.f32.mrb[14].mxu0  ;;  %972 = vmatpush3.bf16.msra.mxu1 %v1192_v17 }
 0x114   :  { %v201_v1 = vadd.f32 %v750_v63, %v1210_v21  ;;  %v195_v2 = vpop.f32.mrb[15].mxu0  ;;  %965 = vmatprep.subr.bf16.mxu1 %v1202_v20 }
 0x115   :  { %v196_v3 = vadd.f32 %v1210_v21, %v195_v2  ;;  %801 = vmatprep.mubr.f32.mxu1 %v216_v62 }
 0x116   :  { %802 = vmatmul.mubr.f32.gmra.mrb[12].mxu1 %v217_v0  ;;  %v219_v5 = vmax.f32 %v201_v1, 0.0 }
 0x117   :  { %v218_v4 = vmax.f32 %v196_v3, 0.0  ;;  %973 = vmatpush3.bf16.msra.mxu1 %v1202_v20 }
 0x118   :  { %966 = vmatprep.subr.bf16.mxu1 %v955_v8 }
 0x119   :  { %804 = vmatprep.mubr.f32.mxu1 %v218_v4 }
 0x11a   :  { %805 = vmatmul.mubr.f32.gmra.mrb[14].mxu1 %v219_v5 }
 0x11b   :  { %974 = vmatpush3.bf16.msra.mxu1 %v955_v8 }
 0x1d1   :  { %v785_v10 = vpop.f32.mrb[0].mxu1 }
 0x1d2   :  { %v316_v11 = vadd.f32 %v785_v10, %v596_v9  ;;  %v310_v12 = vpop.f32.mrb[1].mxu1 }
 0x1d3   :  { %v311_v13 = vadd.f32 %v596_v9, %v310_v12 }
 0x1d4   :  { %v390_v16 = vmax.f32 %v316_v11, 0.0 }
 0x1d5   :  { %v389_v14 = vmax.f32 %v311_v13, 0.0  ;;  %v788_v15 = vpop.f32.mrb[2].mxu1 }
 0x1d6   :  { %v326_v17 = vadd.f32 %v788_v15, %v596_v9  ;;  %v320_v18 = vpop.f32.mrb[3].mxu1 }
 0x1d7   :  { %v321_v19 = vadd.f32 %v596_v9, %v320_v18  ;;  %839 = vmatprep.mubr.f32.mxu0 %v389_v14 }
 0x1d8   :  { %840 = vmatmul.mubr.f32.vlgmr.msra.gmra.mrb[16].mxu0 %v390_v16  ;;  %v392_v22 = vmax.f32 %v326_v17, 0.0 }
 0x1d9   :  { %v391_v20 = vmax.f32 %v321_v19, 0.0  ;;  %v791_v21 = vpop.f32.mrb[4].mxu1 }
 0x1da   :  { %v336_v23 = vadd.f32 %v791_v21, %v596_v9  ;;  %v330_v24 = vpop.f32.mrb[5].mxu1 }
 0x1db   :  { %v331_v25 = vadd.f32 %v596_v9, %v330_v24  ;;  %842 = vmatprep.mubr.f32.mxu0 %v391_v20 }
 0x1dc   :  { %843 = vmatmul.mubr.f32.gmra.mrb[18].mxu0 %v392_v22  ;;  %v394_v28 = vmax.f32 %v336_v23, 0.0 }
 0x1dd   :  { %v393_v26 = vmax.f32 %v331_v25, 0.0  ;;  %v794_v27 = vpop.f32.mrb[6].mxu1 }
 0x1de   :  { %v346_v29 = vadd.f32 %v794_v27, %v596_v9  ;;  %v340_v30 = vpop.f32.mrb[7].mxu1 }
 0x1df   :  { %v341_v31 = vadd.f32 %v596_v9, %v340_v30  ;;  %845 = vmatprep.mubr.f32.mxu0 %v393_v26 }
 0x1e0   :  { %846 = vmatmul.mubr.f32.gmra.mrb[20].mxu0 %v394_v28  ;;  %v396_v34 = vmax.f32 %v346_v29, 0.0 }
 0x1e1   :  { %v395_v32 = vmax.f32 %v341_v31, 0.0  ;;  %v797_v33 = vpop.f32.mrb[8].mxu1 }
 0x1e2   :  { %v356_v35 = vadd.f32 %v797_v33, %v596_v9  ;;  %v350_v36 = vpop.f32.mrb[9].mxu1 }
 0x1e3   :  { %v351_v37 = vadd.f32 %v596_v9, %v350_v36  ;;  %848 = vmatprep.mubr.f32.mxu0 %v395_v32 }
 0x1e4   :  { %849 = vmatmul.mubr.f32.gmra.mrb[22].mxu0 %v396_v34  ;;  %v398_v40 = vmax.f32 %v356_v35, 0.0 }
 0x1e5   :  { %v397_v38 = vmax.f32 %v351_v37, 0.0  ;;  %v800_v39 = vpop.f32.mrb[10].mxu1 }
 0x1e6   :  { %v366_v41 = vadd.f32 %v800_v39, %v596_v9  ;;  %v360_v42 = vpop.f32.mrb[11].mxu1 }
 0x1e7   :  { %v361_v43 = vadd.f32 %v596_v9, %v360_v42  ;;  %851 = vmatprep.mubr.f32.mxu1 %v397_v38 }
 0x1e8   :  { %852 = vmatmul.mubr.f32.vlgmr.msra.gmra.mrb[16].mxu1 %v398_v40  ;;  %v400_v46 = vmax.f32 %v366_v41, 0.0 }
 0x1e9   :  { %v399_v44 = vmax.f32 %v361_v43, 0.0  ;;  %v803_v45 = vpop.f32.mrb[12].mxu1 }
 0x1ea   :  { %v376_v47 = vadd.f32 %v803_v45, %v596_v9  ;;  %v370_v48 = vpop.f32.mrb[13].mxu1 }
 0x1eb   :  { %v371_v49 = vadd.f32 %v596_v9, %v370_v48  ;;  %854 = vmatprep.mubr.f32.mxu1 %v399_v44 }
 0x1ec   :  { %855 = vmatmul.mubr.f32.gmra.mrb[18].mxu1 %v400_v46  ;;  %v402_v52 = vmax.f32 %v376_v47, 0.0 }
 0x1ed   :  { %v401_v50 = vmax.f32 %v371_v49, 0.0  ;;  %v806_v51 = vpop.f32.mrb[14].mxu1 }
 0x1ee   :  { %v386_v53 = vadd.f32 %v806_v51, %v596_v9  ;;  %v380_v54 = vpop.f32.mrb[15].mxu1 }
 0x1ef   :  { %v381_v55 = vadd.f32 %v596_v9, %v380_v54  ;;  %857 = vmatprep.mubr.f32.mxu1 %v401_v50 }
 0x1f0   :  { %858 = vmatmul.mubr.f32.gmra.mrb[20].mxu1 %v402_v52  ;;  %v404_v57 = vmax.f32 %v386_v53, 0.0 }
 0x1f1   :  { %v403_v56 = vmax.f32 %v381_v55, 0.0 }
 0x1f3   :  { %860 = vmatprep.mubr.f32.mxu1 %v403_v56 }
 0x1f4   :  { %861 = vmatmul.mubr.f32.gmra.mrb[22].mxu1 %v404_v57 }
 0x2ab   :  { %v841_v59 = vpop.f32.mrb[16].mxu0 }
 0x2ac   :  { %v501_v60 = vadd.f32 %v841_v59, %v598_v58  ;;  %v495_v61 = vpop.f32.mrb[17].mxu0 }
 0x2ad   :  { %v496_v62 = vadd.f32 %v598_v58, %v495_v61 }
 0x2ae   :  { %575 = vst [vmem:[%s1301_s5 + $0x8] sm:$0xff] %v501_v60 }
 0x2af   :  { %574 = vst [vmem:[%s1301_s5] sm:$0xff] %v496_v62  ;;  %v844_v63 = vpop.f32.mrb[18].mxu0 }
 0x2b0   :  { %v511_v0 = vadd.f32 %v844_v63, %v598_v58  ;;  %v505_v1 = vpop.f32.mrb[19].mxu0 }
 0x2b1   :  { %v506_v2 = vadd.f32 %v598_v58, %v505_v1 }
 0x2b2   :  { %577 = vst [vmem:[%s1301_s5 + $0x18] sm:$0xff] %v511_v0 }
 0x2b3   :  { %576 = vst [vmem:[%s1301_s5 + $0x10] sm:$0xff] %v506_v2  ;;  %v847_v3 = vpop.f32.mrb[20].mxu0 }
 0x2b4   :  { %v521_v4 = vadd.f32 %v847_v3, %v598_v58  ;;  %v515_v5 = vpop.f32.mrb[21].mxu0 }
 0x2b5   :  { %v516_v6 = vadd.f32 %v598_v58, %v515_v5 }
 0x2b6   :  { %579 = vst [vmem:[%s1301_s5 + $0x28] sm:$0xff] %v521_v4 }
 0x2b7   :  { %578 = vst [vmem:[%s1301_s5 + $0x20] sm:$0xff] %v516_v6  ;;  %v850_v7 = vpop.f32.mrb[22].mxu0 }
 0x2b8   :  { %v531_v8 = vadd.f32 %v850_v7, %v598_v58  ;;  %v525_v9 = vpop.f32.mrb[23].mxu0 }
 0x2b9   :  { %v526_v10 = vadd.f32 %v598_v58, %v525_v9 }
 0x2ba   :  { %581 = vst [vmem:[%s1301_s5 + $0x38] sm:$0xff] %v531_v8 }
 0x2bb   :  { %580 = vst [vmem:[%s1301_s5 + $0x30] sm:$0xff] %v526_v10  ;;  %v853_v11 = vpop.f32.mrb[16].mxu1 }
 0x2bc   :  { %v541_v12 = vadd.f32 %v853_v11, %v598_v58  ;;  %v535_v13 = vpop.f32.mrb[17].mxu1 }
 0x2bd   :  { %v536_v14 = vadd.f32 %v598_v58, %v535_v13 }
 0x2be   :  { %583 = vst [vmem:[%s1301_s5 + $0x48] sm:$0xff] %v541_v12 }
 0x2bf   :  { %582 = vst [vmem:[%s1301_s5 + $0x40] sm:$0xff] %v536_v14  ;;  %v856_v15 = vpop.f32.mrb[18].mxu1 }
 0x2c0   :  { %v551_v16 = vadd.f32 %v856_v15, %v598_v58  ;;  %v545_v17 = vpop.f32.mrb[19].mxu1 }
 0x2c1   :  { %v546_v18 = vadd.f32 %v598_v58, %v545_v17 }
 0x2c2   :  { %585 = vst [vmem:[%s1301_s5 + $0x58] sm:$0xff] %v551_v16 }
 0x2c3   :  { %584 = vst [vmem:[%s1301_s5 + $0x50] sm:$0xff] %v546_v18  ;;  %v859_v19 = vpop.f32.mrb[20].mxu1 }
 0x2c4   :  { %v561_v20 = vadd.f32 %v859_v19, %v598_v58  ;;  %v555_v21 = vpop.f32.mrb[21].mxu1 }
 0x2c5   :  { %v556_v22 = vadd.f32 %v598_v58, %v555_v21 }
 0x2c6   :  { %587 = vst [vmem:[%s1301_s5 + $0x68] sm:$0xff] %v561_v20 }
 0x2c7   :  { %586 = vst [vmem:[%s1301_s5 + $0x60] sm:$0xff] %v556_v22  ;;  %v862_v23 = vpop.f32.mrb[22].mxu1 }
 0x2c8   :  { %v571_v24 = vadd.f32 %v862_v23, %v598_v58  ;;  %v565_v25 = vpop.f32.mrb[23].mxu1 }
 0x2c9   :  { %v566_v26 = vadd.f32 %v598_v58, %v565_v25 }
 0x2ca   :  { %589 = vst [vmem:[%s1301_s5 + $0x78] sm:$0xff] %v571_v24 }
 0x2cb   :  { %588 = vst [vmem:[%s1301_s5 + $0x70] sm:$0xff] %v566_v26 }

</bundles_post_ra>
